<compile_context>
chip_gen: v7x
topology: tpu7x:2x2x1
jax: 0.10.0
libtpu: 0.0.40
codegen_flags: <defaults>
</compile_context>

<pallas_src>
import functools

import jax
import jax.numpy as jnp
from jax import lax
from jax.experimental import pallas as pl
from jax.experimental.pallas import tpu as pltpu


# ~4 MiB per DMA buffer; input + output, each double-buffered => ~16 MiB
# resident.  Safe on v7x (64 MiB VMEM/core) and at/above the HBM-roofline
# knee on all generations for this memory-bound kernel.
_PER_BUFFER_BYTES = 4 * 1024 * 1024
_MIN_GRID_STEPS = 4          # keep the software pipeline primed / megacore fed
_SUB_F32_BYTES = 32 * 1024   # ~8 vregs of live f32 per inner sub-chunk pass
_VMEM_LIMIT_HARD_CAP = 48 * 1024 * 1024


def _vmem_limit_bytes():
    """<= 3/4 of per-core VMEM (never the full 64 MiB on v7x), capped at 48 MiB."""
    try:
        cap = int(getattr(pltpu.get_tpu_info(), "vmem_capacity_bytes"))
    except Exception:
        cap = 128 * 1024 * 1024  # conservative v5e/v6e default
    return min(3 * cap // 4, _VMEM_LIMIT_HARD_CAP)


def _rmsnorm_kernel(x_ref, g_ref, o_ref, *, scale_sq, eps_sq, sub_rows):
    """x_ref/o_ref: (block_rows, dim) VMEM tiles; g_ref: (1, dim)."""
    # Hoisted once per grid step; broadcasts over rows.
    g = g_ref[...].astype(jnp.float32)

    block_rows = x_ref.shape[0]
    n_full = block_rows // sub_rows
    tail = block_rows - n_full * sub_rows

    def process(r, nrows):
        # Pass 1: sum of squares for these rows (f32 accumulation).
        x = x_ref[pl.ds(r, nrows), :].astype(jnp.float32)
        sumsq = jnp.sum(x * x, axis=-1, keepdims=True)
        # 1 / max(||x||_2 * dim**-0.5, eps) == rsqrt(max(sumsq*scale^2, eps^2))
        # (exact for nonnegative operands).  rsqrt issues on the EUP slot.
        inv = lax.rsqrt(jnp.maximum(sumsq * scale_sq, eps_sq))
        # Pass 2 re-reads the rows from VMEM so the f32 copy of x is not kept
        # live across the rsqrt -> bounded vreg pressure, no spills.
        y = x_ref[pl.ds(r, nrows), :].astype(jnp.float32) * inv * g
        o_ref[pl.ds(r, nrows), :] = y.astype(o_ref.dtype)

    def body(i, carry):
        r = i * sub_rows
        if sub_rows % 8 == 0:
            r = pl.multiple_of(r, 8)
        process(r, sub_rows)
        return carry

    if n_full > 0:
        # Modest unroll: enough cross-iteration overlap for the LLO scheduler
        # without re-creating the vreg-pressure problem the chunking solves.
        lax.fori_loop(0, n_full, body, 0, unroll=min(n_full, 4))
    if tail > 0:
        process(n_full * sub_rows, tail)


def _choose_tiling(rows, dim, dtype):
    itemsize = jnp.dtype(dtype).itemsize
    # Full sublane packing: 8 rows for 32-bit, 16 for 16-bit, 32 for 8-bit.
    sublane = {4: 8, 2: 16, 1: 32}.get(itemsize, 8)
    row_io_bytes = dim * itemsize   # HBM/VMEM bytes per row (input or output)
    row_f32_bytes = dim * 4         # in-kernel f32 working set per row

    # Inner sub-chunk: keep the live f32 working set to ~8 vregs.
    sub_rows = max(sublane, _SUB_F32_BYTES // max(row_f32_bytes, 1))
    sub_rows -= sub_rows % sublane
    rows_padded = pl.cdiv(rows, sublane) * sublane
    sub_rows = max(sublane, min(sub_rows, rows_padded))

    # DMA block: ~4 MiB per buffer, built as an integer number of sub-chunks.
    n_sub = max(1, _PER_BUFFER_BYTES // (sub_rows * row_io_bytes))
    block_rows = n_sub * sub_rows

    # Keep >= ~_MIN_GRID_STEPS grid steps when rows allow (pipelining + v7x
    # dual-TensorCore sharding of the "parallel" axis).
    cap = pl.cdiv(pl.cdiv(rows, _MIN_GRID_STEPS), sub_rows) * sub_rows
    block_rows = max(sub_rows, min(block_rows, cap))
    return block_rows, sub_rows


def rmsnorm(x, g, eps=1e-6, block_rows=None):
    """RMSNorm over the last axis of x, matching the PyTorch module exactly."""
    # TODO(synk): for dim < 128 (not lane-dense), fold rows into the lane axis
    # in the wrapper to avoid masked partial vst; current layout is correct but
    # wastes lanes for very narrow normalized dims.
    dim = x.shape[-1]
    scale = float(dim) ** -0.5
    orig_shape = x.shape
    x2 = x.reshape(-1, dim)                       # (rows, dim)
    rows = x2.shape[0]
    itemsize = jnp.dtype(x.dtype).itemsize

    auto_block, sub_rows = _choose_tiling(rows, dim, x.dtype)
    if block_rows is None:
        block_rows = auto_block
    sub_rows = min(sub_rows, block_rows)

    vmem_limit = _vmem_limit_bytes()
    # input + output tiles, each double-buffered, plus g and slack.
    resident = 4 * block_rows * dim * itemsize + 2 * dim * itemsize + (1 << 20)
    if resident > vmem_limit:
        # TODO(synk): two-pass (dim-tiled) reduction for extremely wide rows.
        raise NotImplementedError(
            f"normalized dim={dim} too wide for a single-pass VMEM tile "
            f"({resident} B needed > {vmem_limit} B limit)"
        )

    g2 = g.reshape(1, dim)
    kernel = functools.partial(
        _rmsnorm_kernel,
        scale_sq=scale * scale,
        eps_sq=float(eps) * float(eps),
        sub_rows=sub_rows,
    )

    out = pl.pallas_call(
        kernel,
        out_shape=jax.ShapeDtypeStruct((rows, dim), x.dtype),
        grid_spec=pltpu.PrefetchScalarGridSpec(
            num_scalar_prefetch=0,
            grid=(pl.cdiv(rows, block_rows),),
            in_specs=[
                pl.BlockSpec((block_rows, dim), lambda i: (i, 0)),
                pl.BlockSpec((1, dim), lambda i: (0, 0)),   # g: grid-invariant
            ],
            out_specs=pl.BlockSpec((block_rows, dim), lambda i: (i, 0)),
        ),
        compiler_params=pltpu.CompilerParams(
            dimension_semantics=("parallel",),
            vmem_limit_bytes=vmem_limit,
        ),
        cost_estimate=pl.CostEstimate(
            flops=5 * rows * dim,
            transcendentals=rows,
            bytes_accessed=2 * rows * dim * itemsize + dim * itemsize,
        ),
    )(x2, g2)

    return out.reshape(orig_shape)


def _reference(x, g, eps):
    norm = jnp.linalg.norm(x, axis=-1, keepdims=True) * (x.shape[-1] ** -0.5)
    return x / jnp.maximum(norm, eps) * g


if __name__ == "__main__":
    key = jax.random.PRNGKey(0)
    batch, seq, hidden = 2, 8, 32

    x = jax.random.normal(key, (batch, seq, hidden), dtype=jnp.float32)
    # Deterministic parameter init: g = ones(dim), as in the PyTorch __init__.
    g = jnp.ones((hidden,), dtype=jnp.float32)

    out = jax.block_until_ready(rmsnorm(x, g, eps=1e-6))
    ref = _reference(x, g, 1e-6)
    assert jnp.allclose(out, ref, atol=1e-5, rtol=1e-5), "mismatch vs reference"

    # Partial-final-block + multi-step grid path (rows=21, block_rows=8 -> 3
    # steps, last one masked).  No pad / slice in the wrapper.
    x2 = jax.random.normal(jax.random.PRNGKey(1), (3, 7, hidden), jnp.float32)
    out2 = jax.block_until_ready(rmsnorm(x2, g, eps=1e-6, block_rows=8))
    ref2 = _reference(x2, g, 1e-6)
    assert jnp.allclose(out2, ref2, atol=1e-5, rtol=1e-5), "partial-block mismatch"

    # Wider dim: auto tiling gives a multi-step grid; explicit block_rows=64
    # exercises the multi-sub-chunk inner fori_loop (n_full > 1).
    hidden3 = 256
    g3 = jnp.ones((hidden3,), dtype=jnp.float32)
    x3 = jax.random.normal(jax.random.PRNGKey(2), (4, 16, hidden3), jnp.float32)
    ref3 = _reference(x3, g3, 1e-6)
    out3a = jax.block_until_ready(rmsnorm(x3, g3, eps=1e-6))
    assert jnp.allclose(out3a, ref3, atol=1e-5, rtol=1e-5), "auto-tile mismatch"
    out3b = jax.block_until_ready(rmsnorm(x3, g3, eps=1e-6, block_rows=64))
    assert jnp.allclose(out3b, ref3, atol=1e-5, rtol=1e-5), "chunked-loop mismatch"

    print("KERNEL_OK")
</pallas_src>

<mosaic_0001>
module attributes {stable_mosaic.version = 11 : i64} {
  func.func @_rmsnorm_kernel(%arg0: i32, %arg1: memref<16x32xf32, #tpu.memory_space<vmem>>, %arg2: memref<1x32xf32, #tpu.memory_space<vmem>>, %arg3: memref<16x32xf32, #tpu.memory_space<vmem>>) attributes {dimension_semantics = [#tpu.dimension_semantics<parallel>], iteration_bounds = array<i64: 1>, scalar_prefetch = 0 : i64, scratch_operands = 0 : i64, tpu.core_type = #tpu.core_type<tc>, window_params = [{transform_indices = @transform_0, window_bounds = array<i64: 16, 32>}, {pipeline_mode = #tpu.pipeline_mode<synchronous>, transform_indices = @transform_1, window_bounds = array<i64: 1, 32>}, {transform_indices = @transform_2, window_bounds = array<i64: 16, 32>}]} {
    %c0 = arith.constant 0 : index
    %c0_0 = arith.constant 0 : index
    %0 = vector.load %arg2[%c0, %c0_0] : memref<1x32xf32, #tpu.memory_space<vmem>>, vector<1x32xf32>
    %c0_i32 = arith.constant 0 : i32
    %c16_i32 = arith.constant 16 : i32
    %1 = arith.muli %c0_i32, %c16_i32 : i32
    %2 = tpu.assume_multiple %1, 8 : i32
    %3 = arith.index_cast %2 : i32 to index
    %c0_1 = arith.constant 0 : index
    %4 = vector.load %arg1[%3, %c0_1] : memref<16x32xf32, #tpu.memory_space<vmem>>, vector<16x32xf32>
    %5 = arith.mulf %4, %4 : vector<16x32xf32>
    %cst = arith.constant dense<0.000000e+00> : vector<16xf32>
    %6 = vector.multi_reduction <add>, %5, %cst [1] : vector<16x32xf32> to vector<16xf32>
    %7 = vector.shape_cast %6 : vector<16xf32> to vector<16x1xf32>
    %cst_2 = arith.constant 3.125000e-02 : f32
    %8 = vector.broadcast %cst_2 : f32 to vector<16x1xf32>
    %9 = arith.mulf %7, %8 : vector<16x1xf32>
    %cst_3 = arith.constant 9.99999996E-13 : f32
    %10 = vector.broadcast %cst_3 : f32 to vector<16x1xf32>
    %11 = arith.maximumf %9, %10 : vector<16x1xf32>
    %12 = math.rsqrt %11 : vector<16x1xf32>
    %13 = arith.index_cast %2 : i32 to index
    %c0_4 = arith.constant 0 : index
    %14 = vector.load %arg1[%13, %c0_4] : memref<16x32xf32, #tpu.memory_space<vmem>>, vector<16x32xf32>
    %15 = vector.broadcast %12 : vector<16x1xf32> to vector<16x32xf32>
    %16 = arith.mulf %14, %15 : vector<16x32xf32>
    %17 = vector.broadcast %0 : vector<1x32xf32> to vector<16x32xf32>
    %18 = arith.mulf %16, %17 : vector<16x32xf32>
    %19 = arith.index_cast %2 : i32 to index
    %c0_5 = arith.constant 0 : index
    %20 = vector.load %arg3[%19, %c0_5] : memref<16x32xf32, #tpu.memory_space<vmem>>, vector<16x32xf32>
    tpu.vector_store %arg3[%19, %c0_5], %18 {strides = array<i32>} : memref<16x32xf32, #tpu.memory_space<vmem>>, vector<16x32xf32>,
    %c1_i32 = arith.constant 1 : i32
    return
  }
  func.func @transform_0(%arg0: i32) -> (i32, i32) {
    %c0_i32 = arith.constant 0 : i32
    %c0_i32_0 = arith.constant 0 : i32
    return %arg0, %c0_i32 : i32, i32
  }
  func.func @transform_1(%arg0: i32) -> (i32, i32) {
    %c0_i32 = arith.constant 0 : i32
    %c0_i32_0 = arith.constant 0 : i32
    %c0_i32_1 = arith.constant 0 : i32
    return %c0_i32, %c0_i32_0 : i32, i32
  }
  func.func @transform_2(%arg0: i32) -> (i32, i32) {
    %c0_i32 = arith.constant 0 : i32
    %c0_i32_0 = arith.constant 0 : i32
    return %arg0, %c0_i32 : i32, i32
  }
}

</mosaic_0001>

<bundles_post_ra>
// kernel: tpu_custom_call.1
= control target key start
LH: loop header
LB: loop body
LE: loop exit
PB: predicated region body
PF: predicated region fallthrough
CT: control target
= control target key end

     0   :  { %7 = vsyncpa [#allocation3], 0  ;;  %s186_s0 = inlined_call_operand.hbm [shape: f32[16,32], index: 0, kind: input, shape index: {}]   ;;  %s187_s1 = inlined_call_operand.vmem [shape: f32[1,32], index: 1, kind: input, shape index: {}]   ;;  %s188_s2 = inlined_call_operand.hbm [shape: f32[16,32], index: 2, kind: output, shape index: {}]  }
   0x1   :  { %8 = vsyncpa [#allocation4], 0  ;;  %s130_s9 = smov [#allocation2]   ;;  %s82_s13 = scalar_lea.hbm %s186_s0, 256 }
   0x2   :  { %s14_s10 = sshll.u32 %s130_s9, 4  ;;  %p83_p0 = scmp.ne.s32.totalorder %s186_s0, %s82_s13  ;;  %s15_s10 = int_to_ptr.vmem [resolvable:$true] %s14_s10 }
   0x3   :  { %p86_p1 = scmp.lt.u32.totalorder %s82_s13, %s186_s0 }
   0x5   :  { %p88_p2 = pnand %p86_p1, %p83_p0 }
   0x7   :  { %91 = shalt.err (!%p88_p2)
}
   0x8   :  { %s92_s18 = scalar_lea.vmem %s15_s10, 256  ;;  %p97_p4 = scmp.lt.s32.totalorder %s15_s10, %s15_s10 }
   0x9   :  { %p93_p3 = scmp.ne.s32.totalorder %s15_s10, %s92_s18  ;;  %p98_p5 = scmp.lt.s32.totalorder %s92_s18, %s92_s18 }
   0xb   :  { %p99_p6 = por %p98_p5, %p97_p4 }
   0xd   :  { %p100_p7 = pnand %p99_p6, %p93_p3 }
   0xf   :  { %103 = shalt.err (!%p100_p7)
}
  0x10   :  { %s131_s19 = smov 128   ;;  %s132_s20 = smov 8  }
  0x11   :  { %20 = dma.hbm_to_vmem [thread:$0]  %s186_s0, 256, %s15_s10, [#allocation3], %s131_s19, %s131_s19, %s132_s20  }
  0x12   :  { %126 = dma.done.wait [#allocation3], 256  }
  0x13   :  { %127 = vsyncadd [#allocation3], 4294967040  ;;  %v27_v0 = vld [vmem:[#allocation2] sm:$0xff]  ;;  %vm31_vm0 = vcmask 261120   ;;  %v28_v1 = vld [vmem:[#allocation2 + $0x8] sm:$0xff]  ;;  %s133_s24 = smov [#allocation5]  }
  0x14   :  { %v29_v2 = vmul.f32 %v27_v0, %v27_v0  ;;  %v30_v3 = vmul.f32 %v28_v1, %v28_v1  ;;  %v73_v13 = vld [vmem:[%s187_s1] ss:$0 sm:$0xff]  ;;  %s61_s25 = sshll.u32 %s133_s24, 4  ;;  %s62_s25 = int_to_ptr.vmem [resolvable:$true] %s61_s25 }
  0x15   :  { %s104_s26 = scalar_lea.vmem %s62_s25, 256  ;;  %p109_p9 = scmp.lt.s32.totalorder %s62_s25, %s62_s25 }
  0x16   :  { %v32_v4 = vsel %vm31_vm0, %v29_v2, 0.0  ;;  %v35_v5 = vsel %vm31_vm0, %v30_v3, 0.0  ;;  %p105_p8 = scmp.ne.s32.totalorder %s62_s25, %s104_s26  ;;  %p110_p10 = scmp.lt.s32.totalorder %s104_s26, %s104_s26 }
  0x17   :  { %33 = vadd.xlane.f32.xlu0 %v32_v4 }
  0x18   :  { %p111_p11 = por %p110_p10, %p109_p9 }
  0x1a   :  { %p112_p12 = pnand %p111_p11, %p105_p8 }
  0x1b   :  { %36 = vadd.xlane.f32.xlu0 %v35_v5 }
  0xa4   :  { %v34_v6 = vpop.xlane.xlu0 %33 }
  0xa5   :  { %v38_v7 = vmul.f32 0.03125, %v34_v6 }
  0xa7   :  { %v40_v8 = vmax.f32 %v38_v7, 1e-12 }
  0xa8   :  { %v37_v9 = vpop.xlane.xlu0 %36 }
  0xa9   :  { %78 = vrsqrt.f32 %v40_v8  ;;  %v39_v10 = vmul.f32 0.03125, %v37_v9 }
  0xab   :  { %v41_v11 = vmax.f32 %v39_v10, 1e-12 }
  0xad   :  { %80 = vrsqrt.f32 %v41_v11 }
  0xb3   :  { %v79_v12 = vpop.eup %78 }
  0xb4   :  { %v44_v14 = vmul.f32 %v79_v12, %v27_v0 }
  0xb6   :  { %v52_v15 = vmul.f32 %v73_v13, %v44_v14 }
  0xb7   :  { %v81_v16 = vpop.eup %80 }
  0xb8   :  { %v45_v17 = vmul.f32 %v81_v16, %v28_v1  ;;  %54 = vst.msk [vmem:[#allocation5] sm:$0xff] %vm31_vm0, %v52_v15 }
  0xba   :  { %v53_v18 = vmul.f32 %v73_v13, %v45_v17 }
  0xbc   :  { %55 = vst.msk [vmem:[#allocation5 + $0x8] sm:$0xff] %vm31_vm0, %v53_v18 }
  0xbd   :  { %115 = shalt.err (!%p112_p12)
}
  0xbe   :  { %s116_s28 = scalar_lea.hbm %s188_s2, 256 }
  0xbf   :  { %p117_p13 = scmp.ne.s32.totalorder %s188_s2, %s116_s28  ;;  %p120_p0 = scmp.lt.u32.totalorder %s116_s28, %s188_s2 }
  0xc1   :  { %p122_p1 = pnand %p120_p0, %p117_p13 }
  0xc3   :  { %125 = shalt.err (!%p122_p1)
}
  0xc4   :  { %67 = dma.vmem_to_hbm [thread:$0]  %s62_s25, 256, %s188_s2, [#allocation4], %s131_s19, %s131_s19, %s132_s20  }
  0xc5   :  { %128 = dma.done.wait [#allocation4], 256  }
  0xc6   :  { %129 = vsyncadd [#allocation4], 4294967040 }
  0xc7   :  { %71 = vsyncpa [#allocation3], 1 }
  0xc8   :  { %72 = vsyncpa [#allocation4], 1 }

</bundles_post_ra>
